<compile_context>
chip_gen: v6e
topology: v6e:2x2x1
jax: 0.10.0
libtpu: 0.0.40
codegen_flags: <defaults>
</compile_context>

<pallas_src>
import jax
import jax.numpy as jnp
from jax.experimental import pallas as pl
from jax.experimental.pallas import tpu as pltpu

STATE_DIM = 4     # CartPole-v1 observation_space.shape[0]
HIDDEN = 32
OUT_DIM = 1
TILE_B = 4096     # batch (lane) rows per grid step; lane-dense blocks are tiny in VMEM


def _critic_kernel(xt_ref, w1_ref, b1_ref, w2_ref, b2_ref, o_ref):
    # xt: (4, tb) feature-major (batch on lanes)
    # w1: (32, 4)  b1: (32, 1)  w2: (32, 1)  b2: (1,) scalar in SMEM
    xt = xt_ref[...]
    tb = xt.shape[1]

    # ---- Layer 1: Linear(4 -> 32) as four (32,1)x(1,tb) outer-product
    # accumulations on the VPU (K=4 is far too small to pay MXU latency).
    acc = jnp.broadcast_to(b1_ref[...], (HIDDEN, tb))       # one explicit broadcast
    for k in range(STATE_DIM):                               # static trace-time unroll
        acc = acc + w1_ref[:, k:k + 1] * xt[k:k + 1, :]
    h = jnp.maximum(acc, 0.0)                                # (32, tb), lane-dense

    # ---- Layer 2: Linear(32 -> 1) = sublane reduction over the 32 feature rows.
    w2b = jnp.broadcast_to(w2_ref[...], (HIDDEN, tb))        # one explicit broadcast
    out = jnp.sum(h * w2b, axis=0, keepdims=True) + b2_ref[0]   # (1, tb) lane-dense
    o_ref[...] = out.astype(o_ref.dtype)


def critic_forward(x, w1, b1, w2, b2):
    """x: (B, 4) f32; w1: (32, 4); b1: (32,); w2: (1, 32); b2: (1,).
    Returns (B, 1) f32, matching Linear(4,32) -> ReLU -> Linear(32,1)."""
    B = x.shape[0]

    # Lane-dense input: feed x feature-major (4, B).  The (B,4)->(4,B) transpose
    # is a tiny XLA relayout and makes each x tile one contiguous DMA burst.
    # TODO(synk): could fuse this transpose into the call via allow_input_fusion.
    xt = jnp.transpose(x)                        # (4, B)
    b1c = b1.reshape(HIDDEN, 1)                  # (32, 1)
    w2c = w2.reshape(HIDDEN, OUT_DIM)            # (1,32) -> (32,1), contiguous/free

    # Batch (lane) tiling: blocks must be 128-multiples (or full-extent).  Aim
    # for >=2 balanced tiles so v7x's two TensorCores both get work.
    if B % 128 != 0 and B < 256:
        tb = B                                   # tiny batch: one full-extent block
    else:
        half = -(-B // 256) * 128                # ~ceil(B/2) rounded up to 128
        tb = min(TILE_B, max(128, half))
    nb = pl.cdiv(B, tb)

    cost = pl.CostEstimate(
        flops=2 * B * (STATE_DIM * HIDDEN + HIDDEN),
        transcendentals=0,
        bytes_accessed=4 * (x.size + w1.size + b1.size + w2.size + b2.size
                            + B * OUT_DIM),
    )

    out = pl.pallas_call(
        _critic_kernel,
        out_shape=jax.ShapeDtypeStruct((1, B), jnp.float32),
        grid=(nb,),
        in_specs=[
            pl.BlockSpec((STATE_DIM, tb), lambda i: (0, i)),      # x.T: batch-tiled
            pl.BlockSpec((HIDDEN, STATE_DIM), lambda i: (0, 0)),  # w1: resident
            pl.BlockSpec((HIDDEN, 1), lambda i: (0, 0)),          # b1: resident
            pl.BlockSpec((HIDDEN, OUT_DIM), lambda i: (0, 0)),    # w2: resident
            pl.BlockSpec(memory_space=pltpu.MemorySpace.SMEM),    # b2: scalar in SMEM
        ],
        out_specs=pl.BlockSpec((1, tb), lambda i: (0, i)),        # lane-dense output
        compiler_params=pltpu.CompilerParams(
            dimension_semantics=("parallel",),   # shards batch tiles across v7x's 2 TCs
        ),
        cost_estimate=cost,
    )(xt, w1, b1c, w2c, b2)

    return out.reshape(B, OUT_DIM)               # (1, B) -> (B, 1): contiguous, free


def init_params(key):
    """Deterministic init mimicking nn.Linear defaults (uniform +-1/sqrt(fan_in)),
    in PyTorch weight layouts."""
    k1, k2, k3, k4 = jax.random.split(key, 4)
    bound1 = 1.0 / jnp.sqrt(jnp.float32(STATE_DIM))
    bound2 = 1.0 / jnp.sqrt(jnp.float32(HIDDEN))
    w1 = jax.random.uniform(k1, (HIDDEN, STATE_DIM), jnp.float32, -bound1, bound1)
    b1 = jax.random.uniform(k2, (HIDDEN,), jnp.float32, -bound1, bound1)
    w2 = jax.random.uniform(k3, (OUT_DIM, HIDDEN), jnp.float32, -bound2, bound2)
    b2 = jax.random.uniform(k4, (OUT_DIM,), jnp.float32, -bound2, bound2)
    return w1, b1, w2, b2


def _reference(x, w1, b1, w2, b2):
    h = jnp.maximum(x @ w1.T + b1, 0.0)
    return h @ w2.T + b2


if __name__ == "__main__":
    key = jax.random.PRNGKey(0)
    pkey, xkey_small, xkey_big = jax.random.split(key, 3)
    w1, b1, w2, b2 = init_params(pkey)

    # Small batch of CartPole states: single full-extent block, grid of 1.
    x_small = jax.random.normal(xkey_small, (8, STATE_DIM), jnp.float32)
    out_small = jax.block_until_ready(critic_forward(x_small, w1, b1, w2, b2))
    assert out_small.shape == (8, OUT_DIM)
    assert jnp.allclose(out_small, _reference(x_small, w1, b1, w2, b2),
                        atol=1e-5, rtol=1e-5)

    # Larger batch: exercises the batch grid (2 tiles, including a partial one).
    x_big = jax.random.normal(xkey_big, (1000, STATE_DIM), jnp.float32)
    out_big = jax.block_until_ready(critic_forward(x_big, w1, b1, w2, b2))
    assert out_big.shape == (1000, OUT_DIM)
    assert jnp.allclose(out_big, _reference(x_big, w1, b1, w2, b2),
                        atol=1e-5, rtol=1e-5)

    print("KERNEL_OK")
</pallas_src>

<mosaic_0001>
module attributes {stable_mosaic.version = 11 : i64} {
  func.func @_critic_kernel(%arg0: i32, %arg1: memref<4x8xf32, #tpu.memory_space<vmem>>, %arg2: memref<32x4xf32, #tpu.memory_space<vmem>>, %arg3: memref<32x1xf32, #tpu.memory_space<vmem>>, %arg4: memref<32x1xf32, #tpu.memory_space<vmem>>, %arg5: memref<1xf32, #tpu.memory_space<smem>>, %arg6: memref<1x8xf32, #tpu.memory_space<vmem>>) attributes {dimension_semantics = [#tpu.dimension_semantics<parallel>], iteration_bounds = array<i64: 1>, scalar_prefetch = 0 : i64, scratch_operands = 0 : i64, tpu.core_type = #tpu.core_type<tc>, window_params = [{transform_indices = @transform_0, window_bounds = array<i64: 4, 8>}, {pipeline_mode = #tpu.pipeline_mode<synchronous>, transform_indices = @transform_1, window_bounds = array<i64: 32, 4>}, {pipeline_mode = #tpu.pipeline_mode<synchronous>, transform_indices = @transform_2, window_bounds = array<i64: 32, 1>}, {pipeline_mode = #tpu.pipeline_mode<synchronous>, transform_indices = @transform_3, window_bounds = array<i64: 32, 1>}, {transform_indices = @transform_4, window_bounds = array<i64: 1>}, {transform_indices = @transform_5, window_bounds = array<i64: 1, 8>}]} {
    %c0 = arith.constant 0 : index
    %c0_0 = arith.constant 0 : index
    %0 = vector.load %arg1[%c0, %c0_0] : memref<4x8xf32, #tpu.memory_space<vmem>>, vector<4x8xf32>
    %c0_1 = arith.constant 0 : index
    %c0_2 = arith.constant 0 : index
    %1 = vector.load %arg3[%c0_1, %c0_2] : memref<32x1xf32, #tpu.memory_space<vmem>>, vector<32x1xf32>
    %2 = vector.shape_cast %1 : vector<32x1xf32> to vector<32x1xf32>
    %3 = vector.broadcast %2 : vector<32x1xf32> to vector<32x8xf32>
    %c0_3 = arith.constant 0 : index
    %c0_4 = arith.constant 0 : index
    %4 = vector.load %arg2[%c0_3, %c0_4] : memref<32x4xf32, #tpu.memory_space<vmem>>, vector<32x1xf32>
    %5 = vector.extract_strided_slice %0 {offsets = [0, 0], sizes = [1, 8], strides = [1, 1]} : vector<4x8xf32> to vector<1x8xf32>
    %6 = vector.broadcast %4 : vector<32x1xf32> to vector<32x8xf32>
    %7 = vector.broadcast %5 : vector<1x8xf32> to vector<32x8xf32>
    %8 = arith.mulf %6, %7 : vector<32x8xf32>
    %9 = arith.addf %3, %8 : vector<32x8xf32>
    %c0_5 = arith.constant 0 : index
    %c1 = arith.constant 1 : index
    %10 = vector.load %arg2[%c0_5, %c1] : memref<32x4xf32, #tpu.memory_space<vmem>>, vector<32x1xf32>
    %11 = vector.extract_strided_slice %0 {offsets = [1, 0], sizes = [1, 8], strides = [1, 1]} : vector<4x8xf32> to vector<1x8xf32>
    %12 = vector.broadcast %10 : vector<32x1xf32> to vector<32x8xf32>
    %13 = vector.broadcast %11 : vector<1x8xf32> to vector<32x8xf32>
    %14 = arith.mulf %12, %13 : vector<32x8xf32>
    %15 = arith.addf %9, %14 : vector<32x8xf32>
    %c0_6 = arith.constant 0 : index
    %c2 = arith.constant 2 : index
    %16 = vector.load %arg2[%c0_6, %c2] : memref<32x4xf32, #tpu.memory_space<vmem>>, vector<32x1xf32>
    %17 = vector.extract_strided_slice %0 {offsets = [2, 0], sizes = [1, 8], strides = [1, 1]} : vector<4x8xf32> to vector<1x8xf32>
    %18 = vector.broadcast %16 : vector<32x1xf32> to vector<32x8xf32>
    %19 = vector.broadcast %17 : vector<1x8xf32> to vector<32x8xf32>
    %20 = arith.mulf %18, %19 : vector<32x8xf32>
    %21 = arith.addf %15, %20 : vector<32x8xf32>
    %c0_7 = arith.constant 0 : index
    %c3 = arith.constant 3 : index
    %22 = vector.load %arg2[%c0_7, %c3] : memref<32x4xf32, #tpu.memory_space<vmem>>, vector<32x1xf32>
    %23 = vector.extract_strided_slice %0 {offsets = [3, 0], sizes = [1, 8], strides = [1, 1]} : vector<4x8xf32> to vector<1x8xf32>
    %24 = vector.broadcast %22 : vector<32x1xf32> to vector<32x8xf32>
    %25 = vector.broadcast %23 : vector<1x8xf32> to vector<32x8xf32>
    %26 = arith.mulf %24, %25 : vector<32x8xf32>
    %27 = arith.addf %21, %26 : vector<32x8xf32>
    %cst = arith.constant 0.000000e+00 : f32
    %28 = vector.broadcast %cst : f32 to vector<32x8xf32>
    %29 = arith.maximumf %27, %28 : vector<32x8xf32>
    %c0_8 = arith.constant 0 : index
    %c0_9 = arith.constant 0 : index
    %30 = vector.load %arg4[%c0_8, %c0_9] : memref<32x1xf32, #tpu.memory_space<vmem>>, vector<32x1xf32>
    %31 = vector.shape_cast %30 : vector<32x1xf32> to vector<32x1xf32>
    %32 = vector.broadcast %31 : vector<32x1xf32> to vector<32x8xf32>
    %33 = arith.mulf %29, %32 : vector<32x8xf32>
    %cst_10 = arith.constant dense<0.000000e+00> : vector<8xf32>
    %34 = vector.multi_reduction <add>, %33, %cst_10 [0] : vector<32x8xf32> to vector<8xf32>
    %35 = vector.shape_cast %34 : vector<8xf32> to vector<1x8xf32>
    %c0_11 = arith.constant 0 : index
    %36 = memref.load %arg5[%c0_11] : memref<1xf32, #tpu.memory_space<smem>>
    %37 = vector.broadcast %36 : f32 to vector<1x8xf32>
    %38 = arith.addf %35, %37 : vector<1x8xf32>
    %c0_12 = arith.constant 0 : index
    %c0_13 = arith.constant 0 : index
    %39 = vector.load %arg6[%c0_12, %c0_13] : memref<1x8xf32, #tpu.memory_space<vmem>>, vector<1x8xf32>
    tpu.vector_store %arg6[%c0_12, %c0_13], %38 {strides = array<i32>} : memref<1x8xf32, #tpu.memory_space<vmem>>, vector<1x8xf32>,
    return
  }
  func.func @transform_0(%arg0: i32) -> (i32, i32) {
    %c0_i32 = arith.constant 0 : i32
    %c0_i32_0 = arith.constant 0 : i32
    return %c0_i32, %arg0 : i32, i32
  }
  func.func @transform_1(%arg0: i32) -> (i32, i32) {
    %c0_i32 = arith.constant 0 : i32
    %c0_i32_0 = arith.constant 0 : i32
    %c0_i32_1 = arith.constant 0 : i32
    return %c0_i32, %c0_i32_0 : i32, i32
  }
  func.func @transform_2(%arg0: i32) -> (i32, i32) {
    %c0_i32 = arith.constant 0 : i32
    %c0_i32_0 = arith.constant 0 : i32
    %c0_i32_1 = arith.constant 0 : i32
    return %c0_i32, %c0_i32_0 : i32, i32
  }
  func.func @transform_3(%arg0: i32) -> (i32, i32) {
    %c0_i32 = arith.constant 0 : i32
    %c0_i32_0 = arith.constant 0 : i32
    %c0_i32_1 = arith.constant 0 : i32
    return %c0_i32, %c0_i32_0 : i32, i32
  }
  func.func @transform_4(%arg0: i32) -> i32 {
    %c0_i32 = arith.constant 0 : i32
    %c0_i32_0 = arith.constant 0 : i32
    return %c0_i32 : i32
  }
  func.func @transform_5(%arg0: i32) -> (i32, i32) {
    %c0_i32 = arith.constant 0 : i32
    %c0_i32_0 = arith.constant 0 : i32
    return %c0_i32, %arg0 : i32, i32
  }
}

</mosaic_0001>

<bundles_post_ra>
// kernel: tpu_custom_call.1
= control target key start
LH: loop header
LB: loop body
LE: loop exit
PB: predicated region body
PF: predicated region fallthrough
CT: control target
= control target key end

     0   :  { %v274_v2 = vmov 0   ;;  %s354_s0 = inlined_call_operand.vmem [shape: f32[4,8], index: 0, kind: input, shape index: {}]   ;;  %s355_s1 = inlined_call_operand.vmem [shape: f32[32,4], index: 1, kind: input, shape index: {}]   ;;  %s356_s2 = inlined_call_operand.vmem [shape: f32[32,1], index: 2, kind: input, shape index: {}]   ;;  %s357_s3 = inlined_call_operand.vmem [shape: f32[32,1], index: 3, kind: input, shape index: {}]   ;;  %s358_s4 = inlined_call_operand.<no memory space> [shape: f32[1], index: 4, kind: input, shape index: {}]   ;;  %s359_s5 = inlined_call_operand.hbm [shape: f32[1,8], index: 5, kind: output, shape index: {}]  }
   0x1   :  { %v47_v0 = vld [vmem:[%s355_s1] sm:$0xff]  ;;  %238 = vset.pattern.permute.xlu1 %v274_v2  ;;  %237 = vset.pattern.permute.xlu0 %v274_v2  ;;  %v48_v3 = vld [vmem:[%s355_s1 + $0x8] sm:$0xff] }
   0x2   :  { %v23_v1 = vld [vmem:[%s356_s2] sm:$0xff]  ;;  %53 = vperm.xlu0 %237, %v47_v0   ;;  %v24_v4 = vld [vmem:[%s356_s2 + $0x8] sm:$0xff] }
   0x3   :  { %29 = vperm.xlu1 %238, %v23_v1  }
   0x4   :  { %11 = vsyncpa [#allocation4], 0  ;;  %v49_v5 = vld [vmem:[%s355_s1 + $0x10] sm:$0xff]  ;;  %v275_v6 = vmov 1   ;;  %v50_v8 = vld [vmem:[%s355_s1 + $0x18] sm:$0xff]  ;;  %v276_v9 = vmov 2   ;;  %v71_v25 = vlaneseq }
   0x5   :  { %v25_v7 = vld [vmem:[%s356_s2 + $0x10] sm:$0xff]  ;;  %v26_v10 = vld [vmem:[%s356_s2 + $0x18] sm:$0xff]  ;;  %v277_v11 = vmov 3   ;;  %v172_v12 = vld [vmem:[%s357_s3 + $0x8] sm:$0xff]  ;;  %vm199_vm0 = vcmask 64512   ;;  %s278_s17 = smov [#allocation3]  }
   0x6   :  { %58 = vperm.xlu0 %237, %v48_v3   ;;  %v171_v13 = vld [vmem:[%s357_s3] sm:$0xff]  ;;  %v173_v14 = vld [vmem:[%s357_s3 + $0x10] sm:$0xff]  ;;  %v174_v15 = vld [vmem:[%s357_s3 + $0x18] sm:$0xff]  ;;  %v72_v28 = vshrl.u32 %v71_v25, 7  ;;  %s224_s18 = sshll.u32 %s278_s17, 4  ;;  %vm216_vm1 = vcmask 57344   ;;  %s225_s18 = int_to_ptr.vmem [resolvable:$true] %s224_s18 }
   0x7   :  { %34 = vperm.xlu1 %238, %v24_v4   ;;  %v22_v32 = vld [vmem:[%s354_s0] sm:$0xf]  ;;  %s252_s19 = scalar_lea.vmem %s225_s18, 16  ;;  %s256_s20 = scalar_lea.vmem %s225_s18, 32 }
   0x8   :  { %v73_v31 = vsub.s32 0, %v72_v28  ;;  %v101_v33 = vsub.s32 1, %v72_v28  ;;  %v129_v36 = vsub.s32 2, %v72_v28  ;;  %v157_v41 = vsub.s32 3, %v72_v28  ;;  %p253_p0 = scmp.ne.s32.totalorder %s225_s18, %s252_s19  ;;  %p257_p1 = scmp.lt.s32.totalorder %s225_s18, %s225_s18 }
   0x9   :  { %p258_p2 = scmp.lt.s32.totalorder %s256_s20, %s252_s19 }
   0xa   :  { %63 = vperm.xlu0 %237, %v49_v5   ;;  %v74_v35 = vrot.slane %v22_v32, %v73_v31  ;;  %v102_v38 = vrot.slane %v22_v32, %v101_v33  ;;  %v130_v40 = vrot.slane %v22_v32, %v129_v36  ;;  %v158_v50 = vrot.slane %v22_v32, %v157_v41 }
   0xb   :  { %239 = vset.pattern.permute.xlu1 %v275_v6  ;;  %p259_p3 = por %p258_p2, %p257_p1 }
   0xc   :  { %84 = vperm.xlu1 %239, %v47_v0  }
   0xd   :  { %p260_p4 = pnand %p259_p3, %p253_p0 }
   0xe   :  { %240 = vset.pattern.permute.xlu0 %v275_v6 }
   0xf   :  { %88 = vperm.xlu0 %240, %v48_v3  }
  0x10   :  { %241 = vset.pattern.permute.xlu1 %v274_v2 }
  0x11   :  { %39 = vperm.xlu1 %241, %v25_v7  }
  0x13   :  { %92 = vperm.xlu0 %240, %v49_v5  }
  0x15   :  { %68 = vperm.xlu1 %241, %v50_v8  }
  0x17   :  { %243 = vset.pattern.permute.xlu0 %v276_v9 }
  0x18   :  { %116 = vperm.xlu0 %243, %v48_v3  }
  0x19   :  { %242 = vset.pattern.permute.xlu1 %v276_v9 }
  0x1a   :  { %112 = vperm.xlu1 %242, %v47_v0  }
  0x1c   :  { %120 = vperm.xlu0 %243, %v49_v5  }
  0x1e   :  { %244 = vset.pattern.permute.xlu1 %v274_v2 }
  0x1f   :  { %44 = vperm.xlu1 %244, %v26_v10  }
  0x20   :  { %247 = vset.pattern.permute.xlu0 %v277_v11 }
  0x21   :  { %144 = vperm.xlu0 %247, %v48_v3  }
  0x23   :  { %245 = vset.pattern.permute.xlu1 %v275_v6 }
  0x24   :  { %96 = vperm.xlu1 %245, %v50_v8  }
  0x25   :  { %152 = vperm.xlu0 %247, %v50_v8  }
  0x28   :  { %246 = vset.pattern.permute.xlu1 %v277_v11 }
  0x29   :  { %140 = vperm.xlu1 %246, %v47_v0   ;;  %251 = vset.pattern.permute.xlu0 %v274_v2 }
  0x2a   :  { %182 = vperm.xlu0 %251, %v172_v12  }
  0x2d   :  { %248 = vset.pattern.permute.xlu1 %v276_v9 }
  0x2e   :  { %124 = vperm.xlu1 %248, %v50_v8  }
  0x32   :  { %249 = vset.pattern.permute.xlu1 %v277_v11 }
  0x33   :  { %148 = vperm.xlu1 %249, %v49_v5  }
  0x37   :  { %250 = vset.pattern.permute.xlu1 %v274_v2 }
  0x38   :  { %177 = vperm.xlu1 %250, %v171_v13  }
  0x3c   :  { %187 = vperm.xlu1 %250, %v173_v14  }
  0x40   :  { %192 = vperm.xlu1 %250, %v174_v15  }
  0x7d   :  { %v54_v16 = vpop.permute.xlu0 %53 }
  0x7e   :  { %v30_v17 = vpop.permute.xlu1 %29  ;;  %v75_v39 = vmul.f32 %v74_v35, %v54_v16 }
  0x80   :  { %v79_v48 = vadd.f32 %v75_v39, %v30_v17  ;;  %v214_v39 = vstv %s358_s4 }
  0x81   :  { %v59_v19 = vpop.permute.xlu0 %58 }
  0x82   :  { %v35_v18 = vpop.permute.xlu1 %34  ;;  %v76_v43 = vmul.f32 %v74_v35, %v59_v19 }
  0x84   :  { %v80_v51 = vadd.f32 %v76_v43, %v35_v18 }
  0x85   :  { %v64_v21 = vpop.permute.xlu0 %63 }
  0x86   :  { %v77_v45 = vmul.f32 %v74_v35, %v64_v21 }
  0x87   :  { %v85_v20 = vpop.permute.xlu1 %84 }
  0x88   :  { %v103_v44 = vmul.f32 %v102_v38, %v85_v20 }
  0x8a   :  { %v89_v23 = vpop.permute.xlu0 %88  ;;  %v107_v54 = vadd.f32 %v103_v44, %v79_v48 }
  0x8b   :  { %v104_v46 = vmul.f32 %v102_v38, %v89_v23 }
  0x8c   :  { %v40_v22 = vpop.permute.xlu1 %39 }
  0x8d   :  { %v108_v57 = vadd.f32 %v104_v46, %v80_v51  ;;  %v81_v58 = vadd.f32 %v77_v45, %v40_v22 }
  0x8e   :  { %v93_v26 = vpop.permute.xlu0 %92 }
  0x8f   :  { %v105_v52 = vmul.f32 %v102_v38, %v93_v26 }
  0x90   :  { %v69_v24 = vpop.permute.xlu1 %68 }
  0x91   :  { %v78_v59 = vmul.f32 %v74_v35, %v69_v24  ;;  %v109_v0 = vadd.f32 %v105_v52, %v81_v58 }
  0x93   :  { %v117_v30 = vpop.permute.xlu0 %116 }
  0x94   :  { %v132_v55 = vmul.f32 %v130_v40, %v117_v30 }
  0x95   :  { %v113_v27 = vpop.permute.xlu1 %112 }
  0x96   :  { %v131_v49 = vmul.f32 %v130_v40, %v113_v27  ;;  %v136_v2 = vadd.f32 %v132_v55, %v108_v57 }
  0x97   :  { %v121_v37 = vpop.permute.xlu0 %120 }
  0x98   :  { %v135_v60 = vadd.f32 %v131_v49, %v107_v54  ;;  %v133_v61 = vmul.f32 %v130_v40, %v121_v37 }
  0x9a   :  { %v45_v29 = vpop.permute.xlu1 %44  ;;  %v137_v8 = vadd.f32 %v133_v61, %v109_v0 }
  0x9b   :  { %v82_v3 = vadd.f32 %v78_v59, %v45_v29 }
  0x9c   :  { %v145_v47 = vpop.permute.xlu0 %144 }
  0x9d   :  { %v160_v62 = vmul.f32 %v158_v50, %v145_v47 }
  0x9f   :  { %v97_v34 = vpop.permute.xlu1 %96  ;;  %v164_v9 = vadd.f32 %v160_v62, %v136_v2 }
  0xa0   :  { %v106_v63 = vmul.f32 %v102_v38, %v97_v34  ;;  %v153_v1 = vpop.permute.xlu0 %152 }
  0xa1   :  { %v162_v11 = vmul.f32 %v158_v50, %v153_v1  ;;  %v168_v17 = vmax.f32 %v164_v9, 0.0 }
  0xa2   :  { %v110_v10 = vadd.f32 %v106_v63, %v82_v3 }
  0xa4   :  { %v141_v42 = vpop.permute.xlu1 %140 }
  0xa5   :  { %v159_v56 = vmul.f32 %v158_v50, %v141_v42  ;;  %v183_v15 = vpop.permute.xlu0 %182 }
  0xa6   :  { %v196_v19 = vmul.f32 %v183_v15, %v168_v17 }
  0xa7   :  { %v163_v4 = vadd.f32 %v159_v56, %v135_v60 }
  0xa8   :  { %v201_v25 = vsel %vm199_vm0, %v196_v19, 0.0 }
  0xa9   :  { %v125_v53 = vpop.permute.xlu1 %124  ;;  %v167_v14 = vmax.f32 %v163_v4, 0.0 }
  0xaa   :  { %v134_v5 = vmul.f32 %v130_v40, %v125_v53 }
  0xac   :  { %v138_v12 = vadd.f32 %v134_v5, %v110_v10 }
  0xae   :  { %v149_v6 = vpop.permute.xlu1 %148  ;;  %v166_v21 = vadd.f32 %v162_v11, %v138_v12 }
  0xaf   :  { %v161_v7 = vmul.f32 %v158_v50, %v149_v6 }
  0xb0   :  { %v170_v27 = vmax.f32 %v166_v21, 0.0 }
  0xb1   :  { %v165_v13 = vadd.f32 %v161_v7, %v137_v8 }
  0xb3   :  { %v178_v16 = vpop.permute.xlu1 %177  ;;  %v169_v20 = vmax.f32 %v165_v13, 0.0 }
  0xb4   :  { %v195_v18 = vmul.f32 %v178_v16, %v167_v14 }
  0xb6   :  { %v200_v23 = vsel %vm199_vm0, %v195_v18, 0.0 }
  0xb7   :  { %v188_v22 = vpop.permute.xlu1 %187  ;;  %v202_v28 = vadd.f32 %v201_v25, %v200_v23 }
  0xb8   :  { %v197_v24 = vmul.f32 %v188_v22, %v169_v20 }
  0xba   :  { %v203_v26 = vsel %vm199_vm0, %v197_v24, 0.0 }
  0xbb   :  { %v193_v29 = vpop.permute.xlu1 %192  ;;  %v204_v31 = vadd.f32 %v203_v26, %v202_v28 }
  0xbc   :  { %v198_v30 = vmul.f32 %v193_v29, %v170_v27 }
  0xbe   :  { %v205_v32 = vsel %vm199_vm0, %v198_v30, 0.0 }
  0xbf   :  { %v206_v33 = vadd.f32 %v205_v32, %v204_v31 }
  0xc1   :  { %v207_v34 = vrot.slane %v206_v33, 4 }
  0xc3   :  { %v208_v35 = vadd.f32 %v207_v34, %v206_v33 }
  0xc5   :  { %v209_v36 = vrot.slane %v208_v35, 2 }
  0xc7   :  { %v210_v37 = vadd.f32 %v209_v36, %v208_v35 }
  0xc9   :  { %v211_v38 = vrot.slane %v210_v37, 1 }
  0xcb   :  { %v212_v40 = vadd.f32 %v211_v38, %v210_v37 }
  0xcd   :  { %v215_v41 = vadd.f32 %v214_v39, %v212_v40 }
  0xcf   :  { %217 = vst.msk [vmem:[#allocation3] sm:$0x1] %vm216_vm1, %v215_v41 }
  0xd0   :  { %263 = shalt.err (!%p260_p4)
}
  0xd1   :  { %227 = dma.vmem_to_hbm [thread:$0]  %s225_s18, 16, %s359_s5, [#allocation4]  }
  0xd2   :  { %272 = dma.done.wait [#allocation4], 16  }
  0xd3   :  { %273 = vsyncadd [#allocation4], 4294967280 }
  0xd4   :  { %231 = vsyncpa [#allocation4], 1 }

</bundles_post_ra>
